<compile_context>
chip_gen: v7x
topology: tpu7x:2x2x1
jax: 0.10.0
libtpu: 0.0.40
codegen_flags: <defaults>
</compile_context>

<pallas_src>
import math

import jax
import jax.numpy as jnp
from jax.experimental import pallas as pl
from jax.experimental.pallas import tpu as pltpu


def _layerscale_kernel(x_ref, gamma_ref, o_ref):
    # x_ref: (tile_rows, lane), gamma_ref: (1, lane) -> broadcast multiply on the VPU.
    o_ref[...] = x_ref[...] * gamma_ref[...]


def _round_up(a: int, b: int) -> int:
    return ((a + b - 1) // b) * b


def layer_scale(x: jax.Array, gamma: jax.Array) -> jax.Array:
    """Computes x * gamma where gamma has shape (dim,) and dim == x.shape[-1]."""
    orig_shape = x.shape
    dim = orig_shape[-1]
    assert gamma.shape == (dim,)
    # Match PyTorch low-precision-param behavior: gamma lives in x's dtype.
    gamma = gamma.astype(x.dtype)

    total = x.size
    itemsize = jnp.dtype(x.dtype).itemsize
    sublane = max(8, 32 // itemsize)            # 8 for f32, 16 for bf16, 32 for 8-bit
    target_block_bytes = 2 * 1024 * 1024        # ~2 MiB per block, VMEM-safe on all gens

    # --- Lane-dense repack ------------------------------------------------------------
    # Fold consecutive "rows" of dim so the lane width is a multiple of 128 (and ~512
    # wide where cheap).  gamma repeats exactly (lane % dim == 0) so values are identical.
    base = (dim * 128) // math.gcd(dim, 128)    # lcm(dim, 128)
    if base * itemsize * sublane <= target_block_bytes:
        lane = base
        while lane < 512 and lane * 2 * itemsize * sublane <= target_block_bytes:
            lane *= 2
    else:
        # Pathologically wide lcm (odd huge dim): keep the natural channel layout.
        lane = dim
    repeat = lane // dim

    # --- Block sizing -----------------------------------------------------------------
    bytes_per_row = lane * itemsize
    target_rows = max(sublane, (target_block_bytes // bytes_per_row) // sublane * sublane)

    rows_raw = pl.cdiv(total, lane)
    if rows_raw >= 2 * sublane:
        # At least 2 grid steps (v7x megacore) and sublane-aligned tiles <= ~2 MiB.
        steps = max(2, pl.cdiv(rows_raw, target_rows))
        tile_rows = _round_up(pl.cdiv(rows_raw, steps), sublane)
    else:
        tile_rows = rows_raw                    # tiny input: one full-extent block
    rows = _round_up(rows_raw, tile_rows)       # tile_rows divides rows exactly
    padded_total = rows * lane

    x_flat = x.reshape(-1)
    if padded_total != total:
        x_flat = jnp.pad(x_flat, (0, padded_total - total))
    x2d = x_flat.reshape(rows, lane)
    gamma2d = jnp.tile(gamma, repeat).reshape(1, lane)

    grid = (rows // tile_rows,)

    out = pl.pallas_call(
        _layerscale_kernel,
        out_shape=jax.ShapeDtypeStruct((rows, lane), x.dtype),
        grid_spec=pltpu.PrefetchScalarGridSpec(
            num_scalar_prefetch=0,
            grid=grid,
            in_specs=[
                pl.BlockSpec((tile_rows, lane), lambda i: (i, 0)),
                pl.BlockSpec((1, lane), lambda i: (0, 0)),
            ],
            out_specs=pl.BlockSpec((tile_rows, lane), lambda i: (i, 0)),
        ),
        compiler_params=pltpu.CompilerParams(
            dimension_semantics=("parallel",),
        ),
    )(x2d, gamma2d)

    out_flat = out.reshape(-1)
    if padded_total != total:
        out_flat = out_flat[:total]
    return out_flat.reshape(orig_shape)


if __name__ == "__main__":
    # Module params: dim=32, gamma initialized to init_values * ones(dim)
    dim = 32
    init_values = 1e-05
    gamma = init_values * jnp.ones((dim,), dtype=jnp.float32)

    # Example input: (batch=2, seq=8, dim=32)
    key = jax.random.PRNGKey(0)
    x = jax.random.normal(key, (2, 8, dim), dtype=jnp.float32)

    y = layer_scale(x, gamma)
    jax.block_until_ready(y)
    assert jnp.allclose(y, x * gamma, atol=1e-6, rtol=1e-6), "mismatch vs reference (small)"

    # Second small check exercising the multi-step grid + row-padding path (ViT-ish dims).
    dim2 = 384
    gamma2 = init_values * jnp.ones((dim2,), dtype=jnp.float32)
    x2 = jax.random.normal(jax.random.PRNGKey(0), (4, 197, dim2), dtype=jnp.float32)
    y2 = layer_scale(x2, gamma2)
    jax.block_until_ready(y2)
    assert jnp.allclose(y2, x2 * gamma2, atol=1e-6, rtol=1e-6), "mismatch vs reference (padded)"

    print("KERNEL_OK")
</pallas_src>

<mosaic_0001>
module attributes {stable_mosaic.version = 11 : i64} {
  func.func @_layerscale_kernel(%arg0: i32, %arg1: memref<1x512xf32, #tpu.memory_space<vmem>>, %arg2: memref<1x512xf32, #tpu.memory_space<vmem>>, %arg3: memref<1x512xf32, #tpu.memory_space<vmem>>) attributes {dimension_semantics = [#tpu.dimension_semantics<parallel>], iteration_bounds = array<i64: 1>, scalar_prefetch = 0 : i64, scratch_operands = 0 : i64, tpu.core_type = #tpu.core_type<tc>, window_params = [{transform_indices = @transform_0, window_bounds = array<i64: 1, 512>}, {pipeline_mode = #tpu.pipeline_mode<synchronous>, transform_indices = @transform_1, window_bounds = array<i64: 1, 512>}, {transform_indices = @transform_2, window_bounds = array<i64: 1, 512>}]} {
    %c0 = arith.constant 0 : index
    %c0_0 = arith.constant 0 : index
    %0 = vector.load %arg1[%c0, %c0_0] : memref<1x512xf32, #tpu.memory_space<vmem>>, vector<1x512xf32>
    %c0_1 = arith.constant 0 : index
    %c0_2 = arith.constant 0 : index
    %1 = vector.load %arg2[%c0_1, %c0_2] : memref<1x512xf32, #tpu.memory_space<vmem>>, vector<1x512xf32>
    %2 = arith.mulf %0, %1 : vector<1x512xf32>
    %c0_3 = arith.constant 0 : index
    %c0_4 = arith.constant 0 : index
    %3 = vector.load %arg3[%c0_3, %c0_4] : memref<1x512xf32, #tpu.memory_space<vmem>>, vector<1x512xf32>
    tpu.vector_store %arg3[%c0_3, %c0_4], %2 {strides = array<i32>} : memref<1x512xf32, #tpu.memory_space<vmem>>, vector<1x512xf32>,
    return
  }
  func.func @transform_0(%arg0: i32) -> (i32, i32) {
    %c0_i32 = arith.constant 0 : i32
    %c0_i32_0 = arith.constant 0 : i32
    return %arg0, %c0_i32 : i32, i32
  }
  func.func @transform_1(%arg0: i32) -> (i32, i32) {
    %c0_i32 = arith.constant 0 : i32
    %c0_i32_0 = arith.constant 0 : i32
    %c0_i32_1 = arith.constant 0 : i32
    return %c0_i32, %c0_i32_0 : i32, i32
  }
  func.func @transform_2(%arg0: i32) -> (i32, i32) {
    %c0_i32 = arith.constant 0 : i32
    %c0_i32_0 = arith.constant 0 : i32
    return %arg0, %c0_i32 : i32, i32
  }
}

</mosaic_0001>

<bundles_post_ra>
// kernel: tpu_custom_call.1
= control target key start
LH: loop header
LB: loop body
LE: loop exit
PB: predicated region body
PF: predicated region fallthrough
CT: control target
= control target key end

     0   :  { %7 = vsyncpa [#allocation3], 0  ;;  %s189_s0 = inlined_call_operand.hbm [shape: f32[1,512], index: 0, kind: input, shape index: {}]   ;;  %s190_s1 = inlined_call_operand.hbm [shape: f32[1,512], index: 1, kind: input, shape index: {}]   ;;  %s191_s2 = inlined_call_operand.hbm [shape: f32[1,512], index: 2, kind: output, shape index: {}]  }
   0x1   :  { %8 = vsyncpa [#allocation6], 0 }
   0x2   :  { %9 = vsyncpa [#allocation4], 0  ;;  %s135_s9 = smov [#allocation2]   ;;  %s136_s11 = smov [#allocation5]  }
   0x3   :  { %s16_s10 = sshll.u32 %s135_s9, 4  ;;  %s26_s12 = sshll.u32 %s136_s11, 4  ;;  %s17_s10 = int_to_ptr.vmem [resolvable:$true] %s16_s10  ;;  %s27_s12 = int_to_ptr.vmem [resolvable:$true] %s26_s12 }
   0x4   :  { %s63_s15 = scalar_lea.hbm %s189_s0, 64 }
   0x5   :  { %p64_p0 = scmp.ne.s32.totalorder %s189_s0, %s63_s15  ;;  %p67_p1 = scmp.lt.u32.totalorder %s63_s15, %s189_s0 }
   0x7   :  { %p69_p2 = pnand %p67_p1, %p64_p0 }
   0x9   :  { %72 = shalt.err (!%p69_p2)
}
   0xa   :  { %s73_s20 = scalar_lea.vmem %s17_s10, 64  ;;  %p78_p4 = scmp.lt.s32.totalorder %s17_s10, %s17_s10 }
   0xb   :  { %p74_p3 = scmp.ne.s32.totalorder %s17_s10, %s73_s20  ;;  %p79_p5 = scmp.lt.s32.totalorder %s73_s20, %s73_s20 }
   0xd   :  { %p80_p6 = por %p79_p5, %p78_p4 }
   0xf   :  { %p81_p7 = pnand %p80_p6, %p74_p3 }
  0x11   :  { %84 = shalt.err (!%p81_p7)
}
  0x12   :  { %19 = dma.hbm_to_vmem [thread:$0]  %s189_s0, 64, %s17_s10, [#allocation3]  }
  0x13   :  { %s85_s25 = scalar_lea.hbm %s190_s1, 64 }
  0x14   :  { %p86_p8 = scmp.ne.s32.totalorder %s190_s1, %s85_s25  ;;  %p89_p9 = scmp.lt.u32.totalorder %s85_s25, %s190_s1 }
  0x16   :  { %p91_p10 = pnand %p89_p9, %p86_p8 }
  0x18   :  { %94 = shalt.err (!%p91_p10)
}
  0x19   :  { %s95_s30 = scalar_lea.vmem %s27_s12, 64  ;;  %p100_p12 = scmp.lt.s32.totalorder %s27_s12, %s27_s12 }
  0x1a   :  { %p96_p11 = scmp.ne.s32.totalorder %s27_s12, %s95_s30  ;;  %p101_p13 = scmp.lt.s32.totalorder %s95_s30, %s95_s30 }
  0x1c   :  { %p102_p0 = por %p101_p13, %p100_p12 }
  0x1e   :  { %p103_p1 = pnand %p102_p0, %p96_p11 }
  0x20   :  { %106 = shalt.err (!%p103_p1)
}
  0x21   :  { %29 = dma.hbm_to_vmem [thread:$0]  %s190_s1, 64, %s27_s12, [#allocation6]  }
  0x22   :  { %129 = dma.done.wait [#allocation3], 64  }
  0x23   :  { %130 = vsyncadd [#allocation3], 4294967232 }
  0x24   :  { %131 = dma.done.wait [#allocation6], 64  }
  0x25   :  { %132 = vsyncadd [#allocation6], 4294967232  ;;  %v39_v0 = vlaneseq  ;;  %s137_s4 = smov [#allocation7]   ;;  %v36_v1 = vld [vmem:[#allocation2] sm:$0xf] }
  0x26   :  { %s50_s5 = sshll.u32 %s137_s4, 4  ;;  %v37_v2 = vld [vmem:[#allocation5] sm:$0xf]  ;;  %s51_s5 = int_to_ptr.vmem [resolvable:$true] %s50_s5 }
  0x27   :  { %vm41_vm0 = vcmp.lt.s32.totalorder %v39_v0, 512  ;;  %v38_v3 = vmul.f32 %v37_v2, %v36_v1  ;;  %s107_s6 = scalar_lea.vmem %s51_s5, 64  ;;  %p112_p3 = scmp.lt.s32.totalorder %s51_s5, %s51_s5 }
  0x28   :  { %p108_p2 = scmp.ne.s32.totalorder %s51_s5, %s107_s6  ;;  %p113_p4 = scmp.lt.s32.totalorder %s107_s6, %s107_s6 }
  0x29   :  { %43 = vst.msk [vmem:[#allocation7] sm:$0xf] %vm41_vm0, %v38_v3 }
  0x2a   :  { %p114_p5 = por %p113_p4, %p112_p3 }
  0x2c   :  { %p115_p6 = pnand %p114_p5, %p108_p2 }
  0x2e   :  { %118 = shalt.err (!%p115_p6)
}
  0x2f   :  { %s119_s8 = scalar_lea.hbm %s191_s2, 64 }
  0x30   :  { %p120_p7 = scmp.ne.s32.totalorder %s191_s2, %s119_s8  ;;  %p123_p8 = scmp.lt.u32.totalorder %s119_s8, %s191_s2 }
  0x32   :  { %p125_p9 = pnand %p123_p8, %p120_p7 }
  0x34   :  { %128 = shalt.err (!%p125_p9)
}
  0x35   :  { %53 = dma.vmem_to_hbm [thread:$0]  %s51_s5, 64, %s191_s2, [#allocation4]  }
  0x36   :  { %133 = dma.done.wait [#allocation4], 64  }
  0x37   :  { %134 = vsyncadd [#allocation4], 4294967232 }
  0x38   :  { %57 = vsyncpa [#allocation3], 1 }
  0x39   :  { %58 = vsyncpa [#allocation6], 1 }
  0x3a   :  { %59 = vsyncpa [#allocation4], 1 }

</bundles_post_ra>
